<compile_context>
chip_gen: v7x
topology: tpu7x:2x2x1
jax: 0.10.0
libtpu: 0.0.40
codegen_flags: <defaults>
</compile_context>

<pallas_src>
import functools

import jax
import jax.numpy as jnp
from jax.experimental import pallas as pl
from jax.experimental.pallas import tpu as pltpu


def _softmax_colsum_kernel(x_ref, out_ref, *, inv_temp, apply_exp, n_rows,
                           tiles_per_core, ever_masked):
    """Accumulate colsum(softmax(x * inv_temp)) (optionally exp'd) for this core's tiles.

    Grid is (core, tile).  out_ref is this core's resident (8, D) partial-sum slab:
    the row-tile is folded into it 8 sublanes at a time; the cross-sublane fold and the
    cross-core combine happen once, in the wrapper.
    """
    c = pl.program_id(0)
    j = pl.program_id(1)
    tm, d = x_ref.shape
    tile_idx = c * tiles_per_core + j          # global row-tile index (may overrun; masked)

    @pl.when(j == 0)
    def _init():
        out_ref[...] = jnp.zeros_like(out_ref)

    def accumulate(masked):
        x = x_ref[...].astype(jnp.float32) * inv_temp
        if masked:
            rows = jax.lax.broadcasted_iota(jnp.int32, (tm, 1), 0) + tile_idx * tm
            in_bounds = rows < n_rows
            x = jnp.where(in_bounds, x, 0.0)               # keep padded/garbage rows finite
        x = x - jnp.max(x, axis=-1, keepdims=True)
        e = jnp.exp(x)
        denom = jnp.sum(e, axis=-1, keepdims=True)
        p = e * (1.0 / denom)                              # exact per-row reciprocal (cheap)
        if apply_exp:
            p = jnp.exp(p)                                 # the .exp_() of the f2 softmax
        if masked:
            p = jnp.where(in_bounds, p, 0.0)               # drop padded rows from the sum
        # Fold the (tm, d) tile into an (8, d) partial, 8 sublanes at a time:
        # tile-aligned static slices -> pure vreg-wise VALU adds, no per-tile XLU fold.
        partial = p[0:8, :]
        for g in range(1, tm // 8):
            partial = partial + p[g * 8:(g + 1) * 8, :]
        out_ref[...] += partial

    if not ever_masked:
        # No tile of this feature can overrun n_rows: never pay for the mask.
        accumulate(masked=False)
    else:
        needs_mask = (tile_idx + 1) * tm > n_rows          # tail / overhanging / duplicate tile

        @pl.when(needs_mask)
        def _tail():
            accumulate(masked=True)

        @pl.when(jnp.logical_not(needs_mask))
        def _full():
            accumulate(masked=False)


def _softmax_colsum(x, inv_temp, *, apply_exp, block_rows=None, num_cores=2,
                    vmem_limit_bytes=32 * 1024 * 1024):
    """Return colsum over rows of softmax(x * inv_temp) (optionally exp'd), shape (D,)."""
    n, d = x.shape
    itemsize = jnp.dtype(x.dtype).itemsize
    sub = max(8, 32 // itemsize)               # min sublane multiple: 8 (f32) / 16 (bf16)

    if block_rows is None:
        # Size the row tile from a VMEM budget: the double-buffered input working set is
        # 2 * block_rows * d * itemsize.  Keep it <= ~8 MiB so input + f32 temporaries fit
        # comfortably inside the explicit 32 MiB scoped-VMEM limit on every generation.
        budget_per_buffer = 4 * 1024 * 1024
        block_rows = (budget_per_buffer // max(1, d * itemsize)) // sub * sub
        block_rows = int(min(1024, max(sub, block_rows)))
    assert block_rows % sub == 0 and block_rows > 0, (
        f"block_rows must be a positive multiple of {sub} for dtype {x.dtype}")

    round_up = lambda v, m: (v + m - 1) // m * m
    tm = min(block_rows, round_up(n, sub))     # row tile (sublane-aligned; may overhang n)
    total_tiles = pl.cdiv(n, tm)
    cores = max(1, min(int(num_cores), total_tiles))
    tiles_per_core = pl.cdiv(total_tiles, cores)
    # Does any (core, tile) slot reach past n?  (tail tile, overhang, or duplicate tile
    # from an uneven core split) -> only then is the masked variant ever needed.
    ever_masked = cores * tiles_per_core * tm > n

    kernel = functools.partial(
        _softmax_colsum_kernel,
        inv_temp=float(inv_temp), apply_exp=bool(apply_exp), n_rows=n,
        tiles_per_core=tiles_per_core, ever_masked=ever_masked)

    partials = pl.pallas_call(
        kernel,
        out_shape=jax.ShapeDtypeStruct((cores * 8, d), jnp.float32),
        grid_spec=pltpu.PrefetchScalarGridSpec(
            num_scalar_prefetch=0,
            grid=(cores, tiles_per_core),
            in_specs=[pl.BlockSpec(
                (tm, d),
                # Clamp once a core's tiles are exhausted; the duplicate tile is fully
                # masked inside the kernel so it contributes exactly zero.
                lambda c, j: (jnp.minimum(c * tiles_per_core + j, total_tiles - 1), 0))],
            # One resident (8, d) accumulator slab per core, written back when c changes.
            out_specs=pl.BlockSpec((8, d), lambda c, j: (c, 0)),
        ),
        compiler_params=pltpu.CompilerParams(
            # Core axis splits across TensorCores on v7x; the tile axis is a reduction
            # into that core's resident output slab.
            dimension_semantics=("parallel", "arbitrary"),
            vmem_limit_bytes=int(vmem_limit_bytes),
        ),
    )(x)
    # Single cross-sublane + cross-core fold, done once in XLA.
    return jnp.sum(partials, axis=0)           # (D,)


def unifyloss(feature1, feature2, tt=1.0, ts=1.0, block_rows=None, num_cores=2):
    """loss = mean(softmax(f1/tt) @ exp(softmax(f2/ts)).T) via two colsum kernels."""
    n1, d = feature1.shape
    n2, d2 = feature2.shape
    assert d == d2, "feature1 and feature2 must share the feature dimension"

    s1 = _softmax_colsum(feature1, 1.0 / tt, apply_exp=False,
                         block_rows=block_rows, num_cores=num_cores)
    s2 = _softmax_colsum(feature2, 1.0 / ts, apply_exp=True,
                         block_rows=block_rows, num_cores=num_cores)
    # mean(P1 @ P2.T) == dot(colsum(P1), colsum(P2)) / (N1 * N2)
    return jnp.dot(s1, s2) / (n1 * n2)


def _reference(feature1, feature2, tt=1.0, ts=1.0):
    f1 = jax.nn.softmax(feature1 / tt, axis=-1)
    f2 = jnp.exp(jax.nn.softmax(feature2 / ts, axis=-1))
    return jnp.mean(f1 @ f2.T)


if __name__ == "__main__":
    key = jax.random.PRNGKey(0)
    k1, k2 = jax.random.split(key)

    # Small shapes consistent with the module: two 2D feature matrices sharing D.
    n1, n2, d = 24, 40, 256
    feature1 = jax.random.normal(k1, (n1, d), dtype=jnp.float32)
    feature2 = jax.random.normal(k2, (n2, d), dtype=jnp.float32)
    tt, ts = 2.0, 0.5

    ref = _reference(feature1, feature2, tt=tt, ts=ts)

    # Default path: auto-derived block_rows (each feature fits one tile here).
    loss = unifyloss(feature1, feature2, tt=tt, ts=ts)
    jax.block_until_ready(loss)
    assert jnp.allclose(loss, ref, rtol=1e-4, atol=1e-4), (loss, ref)

    # Tiled path: small block_rows forces multiple row tiles per feature, exercises the
    # two-core "parallel" axis, the masked tail tile, and the clamped duplicate tile.
    loss_tiled = unifyloss(feature1, feature2, tt=tt, ts=ts, block_rows=16, num_cores=2)
    jax.block_until_ready(loss_tiled)
    assert jnp.allclose(loss_tiled, ref, rtol=1e-4, atol=1e-4), (loss_tiled, ref)

    print(loss)  # mirrors the `print(loss)` in the PyTorch forward
    print("KERNEL_OK")
</pallas_src>

<mosaic_0001>
module attributes {stable_mosaic.version = 11 : i64} {
  func.func @_softmax_colsum_kernel(%arg0: i32, %arg1: i32, %arg2: memref<24x256xf32, #tpu.memory_space<vmem>>, %arg3: memref<8x256xf32, #tpu.memory_space<vmem>>) attributes {dimension_semantics = [#tpu.dimension_semantics<parallel>, #tpu.dimension_semantics<arbitrary>], iteration_bounds = array<i64: 1, 1>, scalar_prefetch = 0 : i64, scratch_operands = 0 : i64, tpu.core_type = #tpu.core_type<tc>, window_params = [{transform_indices = @transform_0, window_bounds = array<i64: 24, 256>}, {transform_indices = @transform_1, window_bounds = array<i64: 8, 256>}]} {
    %c0_i32 = arith.constant 0 : i32
    %0 = arith.cmpi eq, %arg1, %c0_i32 : i32
    %1 = arith.extui %0 : i1 to i32
    %c0_i32_0 = arith.constant 0 : i32
    %2 = arith.cmpi ne, %1, %c0_i32_0 : i32
    scf.if %2 {
      %cst_9 = arith.constant 0.000000e+00 : f32
      %25 = vector.broadcast %cst_9 : f32 to vector<8x256xf32>
      %c0_10 = arith.constant 0 : index
      %c0_11 = arith.constant 0 : index
      %26 = vector.load %arg3[%c0_10, %c0_11] : memref<8x256xf32, #tpu.memory_space<vmem>>, vector<8x256xf32>
      tpu.vector_store %arg3[%c0_10, %c0_11], %25 {strides = array<i32>} : memref<8x256xf32, #tpu.memory_space<vmem>>, vector<8x256xf32>,
    } else {
    }
    %c0 = arith.constant 0 : index
    %c0_1 = arith.constant 0 : index
    %3 = vector.load %arg2[%c0, %c0_1] : memref<24x256xf32, #tpu.memory_space<vmem>>, vector<24x256xf32>
    %cst = arith.constant 5.000000e-01 : f32
    %4 = vector.broadcast %cst : f32 to vector<24x256xf32>
    %5 = arith.mulf %3, %4 : vector<24x256xf32>
    %cst_2 = arith.constant dense<0xFF800000> : vector<24xf32>
    %6 = vector.multi_reduction <maximumf>, %5, %cst_2 [1] : vector<24x256xf32> to vector<24xf32>
    %7 = vector.shape_cast %6 : vector<24xf32> to vector<24x1xf32>
    %8 = vector.broadcast %7 : vector<24x1xf32> to vector<24x256xf32>
    %9 = arith.subf %5, %8 : vector<24x256xf32>
    %10 = math.exp %9 : vector<24x256xf32>
    %cst_3 = arith.constant dense<0.000000e+00> : vector<24xf32>
    %11 = vector.multi_reduction <add>, %10, %cst_3 [1] : vector<24x256xf32> to vector<24xf32>
    %12 = vector.shape_cast %11 : vector<24xf32> to vector<24x1xf32>
    %cst_4 = arith.constant 1.000000e+00 : f32
    %13 = vector.broadcast %cst_4 : f32 to vector<24x1xf32>
    %14 = arith.divf %13, %12 : vector<24x1xf32>
    %15 = vector.broadcast %14 : vector<24x1xf32> to vector<24x256xf32>
    %16 = arith.mulf %10, %15 : vector<24x256xf32>
    %17 = vector.extract_strided_slice %16 {offsets = [0, 0], sizes = [8, 256], strides = [1, 1]} : vector<24x256xf32> to vector<8x256xf32>
    %18 = vector.extract_strided_slice %16 {offsets = [8, 0], sizes = [8, 256], strides = [1, 1]} : vector<24x256xf32> to vector<8x256xf32>
    %19 = arith.addf %17, %18 : vector<8x256xf32>
    %20 = vector.extract_strided_slice %16 {offsets = [16, 0], sizes = [8, 256], strides = [1, 1]} : vector<24x256xf32> to vector<8x256xf32>
    %21 = arith.addf %19, %20 : vector<8x256xf32>
    %c0_5 = arith.constant 0 : index
    %c0_6 = arith.constant 0 : index
    %22 = vector.load %arg3[%c0_5, %c0_6] : memref<8x256xf32, #tpu.memory_space<vmem>>, vector<8x256xf32>
    %23 = arith.addf %22, %21 : vector<8x256xf32>
    %c0_7 = arith.constant 0 : index
    %c0_8 = arith.constant 0 : index
    %24 = vector.load %arg3[%c0_7, %c0_8] : memref<8x256xf32, #tpu.memory_space<vmem>>, vector<8x256xf32>
    tpu.vector_store %arg3[%c0_7, %c0_8], %23 {strides = array<i32>} : memref<8x256xf32, #tpu.memory_space<vmem>>, vector<8x256xf32>,
    return
  }
  func.func @transform_0(%arg0: i32, %arg1: i32) -> (i32, i32) {
    %c1_i32 = arith.constant 1 : i32
    %0 = arith.muli %arg0, %c1_i32 : i32
    %1 = arith.addi %0, %arg1 : i32
    %c0_i32 = arith.constant 0 : i32
    %2 = arith.minsi %1, %c0_i32 : i32
    %c0_i32_0 = arith.constant 0 : i32
    %c0_i32_1 = arith.constant 0 : i32
    return %2, %c0_i32_0 : i32, i32
  }
  func.func @transform_1(%arg0: i32, %arg1: i32) -> (i32, i32) {
    %c0_i32 = arith.constant 0 : i32
    %c0_i32_0 = arith.constant 0 : i32
    return %arg0, %c0_i32 : i32, i32
  }
}

</mosaic_0001>

<bundles_post_ra>
// kernel: tpu_custom_call.1
= control target key start
LH: loop header
LB: loop body
LE: loop exit
PB: predicated region body
PF: predicated region fallthrough
CT: control target
= control target key end

     0   :  { %6 = vsyncpa [#allocation3], 0  ;;  %s236_s0 = inlined_call_operand.hbm [shape: f32[24,256], index: 0, kind: input, shape index: {}]   ;;  %s237_s1 = inlined_call_operand.hbm [shape: f32[8,256], index: 1, kind: output, shape index: {}]  }
   0x1   :  { %7 = vsyncpa [#allocation4], 0  ;;  %s198_s6 = smov [#allocation2]   ;;  %s150_s10 = scalar_lea.hbm %s236_s0, 768 }
   0x2   :  { %s20_s7 = sshll.u32 %s198_s6, 4  ;;  %p151_p0 = scmp.ne.s32.totalorder %s236_s0, %s150_s10  ;;  %s21_s7 = int_to_ptr.vmem [resolvable:$true] %s20_s7 }
   0x3   :  { %p154_p1 = scmp.lt.u32.totalorder %s150_s10, %s236_s0 }
   0x5   :  { %p156_p2 = pnand %p154_p1, %p151_p0 }
   0x7   :  { %159 = shalt.err (!%p156_p2)
}
   0x8   :  { %s160_s15 = scalar_lea.vmem %s21_s7, 768  ;;  %p165_p4 = scmp.lt.s32.totalorder %s21_s7, %s21_s7 }
   0x9   :  { %p161_p3 = scmp.ne.s32.totalorder %s21_s7, %s160_s15  ;;  %p166_p5 = scmp.lt.s32.totalorder %s160_s15, %s160_s15 }
   0xb   :  { %p167_p6 = por %p166_p5, %p165_p4 }
   0xd   :  { %p168_p7 = pnand %p167_p6, %p161_p3 }
   0xf   :  { %171 = shalt.err (!%p168_p7)
}
  0x10   :  { %s199_s16 = smov 256   ;;  %s200_s17 = smov 16  }
  0x11   :  { %26 = dma.hbm_to_vmem [thread:$0]  %s236_s0, 768, %s21_s7, [#allocation3], %s199_s16, %s199_s16, %s200_s17  }
  0x12   :  { %194 = dma.done.wait [#allocation3], 768  }
  0x13   :  { %195 = vsyncadd [#allocation3], 4294966528  ;;  %v40_v0 = vld [vmem:[#allocation2] sm:$0xff]  ;;  %v41_v1 = vld [vmem:[#allocation2 + $0x8] sm:$0xff]  ;;  %s201_s0 = smov [#allocation5]  }
  0x14   :  { %v44_v2 = vld [vmem:[#allocation2 + $0x20] sm:$0xff]  ;;  %v46_v3 = vmul.f32 0.5, %v40_v0  ;;  %v47_v4 = vmul.f32 0.5, %v41_v1  ;;  %v45_v5 = vld [vmem:[#allocation2 + $0x28] sm:$0xff]  ;;  %v42_v7 = vld [vmem:[#allocation2 + $0x10] sm:$0xff]  ;;  %s116_s20 = sshll.u32 %s201_s0, 4  ;;  %s117_s20 = int_to_ptr.vmem [resolvable:$true] %s116_s20 }
  0x15   :  { %v50_v6 = vmul.f32 0.5, %v44_v2  ;;  %v43_v8 = vld [vmem:[#allocation2 + $0x18] sm:$0xff]  ;;  %v51_v9 = vmul.f32 0.5, %v45_v5  ;;  %v48_v10 = vmul.f32 0.5, %v42_v7  ;;  %s172_s21 = scalar_lea.vmem %s117_s20, 256  ;;  %p177_p9 = scmp.lt.s32.totalorder %s117_s20, %s117_s20 }
  0x16   :  { %v49_v11 = vmul.f32 0.5, %v43_v8  ;;  %v52_v12 = vmax.f32 %v46_v3, %v47_v4  ;;  %p173_p8 = scmp.ne.s32.totalorder %s117_s20, %s172_s21  ;;  %p178_p10 = scmp.lt.s32.totalorder %s172_s21, %s172_s21 }
  0x17   :  { %v58_v13 = vmax.f32 %v50_v6, %v51_v9 }
  0x18   :  { %53 = vmax.xlane.f32.xlu0 %v52_v12  ;;  %v55_v14 = vmax.f32 %v48_v10, %v49_v11  ;;  %p179_p11 = por %p178_p10, %p177_p9 }
  0x19   :  { %59 = vmax.xlane.f32.xlu1 %v58_v13 }
  0x1a   :  { %p180_p12 = pnand %p179_p11, %p173_p8 }
  0x1c   :  { %56 = vmax.xlane.f32.xlu0 %v55_v14 }
  0xa5   :  { %v54_v15 = vpop.xlane.xlu0 %53 }
  0xa6   :  { %v61_v16 = vsub.f32 %v46_v3, %v54_v15  ;;  %v62_v17 = vsub.f32 %v47_v4, %v54_v15  ;;  %v60_v18 = vpop.xlane.xlu1 %59 }
  0xa7   :  { %v65_v19 = vsub.f32 %v50_v6, %v60_v18  ;;  %v66_v20 = vsub.f32 %v51_v9, %v60_v18 }
  0xa8   :  { %v67_v21 = vmul.f32 1.442695, %v61_v16  ;;  %v69_v22 = vmul.f32 1.442695, %v62_v17 }
  0xa9   :  { %v75_v23 = vmul.f32 1.442695, %v65_v19  ;;  %v77_v24 = vmul.f32 1.442695, %v66_v20  ;;  %v57_v25 = vpop.xlane.xlu0 %56 }
  0xaa   :  { %132 = vpow2.f32 %v67_v21  ;;  %v63_v26 = vsub.f32 %v48_v10, %v57_v25  ;;  %v64_v27 = vsub.f32 %v49_v11, %v57_v25 }
  0xab   :  { %134 = vpow2.f32 %v69_v22 }
  0xac   :  { %136 = vpow2.f32 %v75_v23  ;;  %v71_v28 = vmul.f32 1.442695, %v63_v26  ;;  %v73_v29 = vmul.f32 1.442695, %v64_v27 }
  0xad   :  { %138 = vpow2.f32 %v77_v24 }
  0xae   :  { %140 = vpow2.f32 %v71_v28 }
  0xaf   :  { %142 = vpow2.f32 %v73_v29 }
  0xb4   :  { %v133_v30 = vpop.eup %132 }
  0xb5   :  { %v135_v31 = vpop.eup %134 }
  0xb6   :  { %v137_v32 = vpop.eup %136  ;;  %v79_v33 = vadd.f32 %v135_v31, %v133_v30 }
  0xb7   :  { %v139_v34 = vpop.eup %138 }
  0xb8   :  { %v141_v35 = vpop.eup %140  ;;  %80 = vadd.xlane.f32.xlu1 %v79_v33  ;;  %v85_v36 = vadd.f32 %v139_v34, %v137_v32 }
  0xb9   :  { %v143_v37 = vpop.eup %142 }
  0xba   :  { %v82_v38 = vadd.f32 %v143_v37, %v141_v35 }
  0xbc   :  { %86 = vadd.xlane.f32.xlu1 %v85_v36  ;;  %83 = vadd.xlane.f32.xlu0 %v82_v38 }
 0x145   :  { %v81_v39 = vpop.xlane.xlu1 %80 }
 0x146   :  { %144 = vrcp.f32 %v81_v39 }
 0x149   :  { %v87_v40 = vpop.xlane.xlu1 %86  ;;  %v84_v41 = vpop.xlane.xlu0 %83 }
 0x14a   :  { %146 = vrcp.f32 %v87_v40 }
 0x14b   :  { %148 = vrcp.f32 %v84_v41 }
 0x150   :  { %v145_v42 = vpop.eup %144 }
 0x151   :  { %v94_v45 = vmul.f32 %v145_v42, %v133_v30  ;;  %v95_v46 = vmul.f32 %v145_v42, %v135_v31 }
 0x154   :  { %v147_v43 = vpop.eup %146 }
 0x155   :  { %v149_v44 = vpop.eup %148  ;;  %v98_v49 = vmul.f32 %v147_v43, %v137_v32  ;;  %v99_v50 = vmul.f32 %v147_v43, %v139_v34 }
 0x156   :  { %v96_v47 = vmul.f32 %v149_v44, %v141_v35  ;;  %v97_v48 = vmul.f32 %v149_v44, %v143_v37 }
 0x158   :  { %v100_v51 = vadd.f32 %v96_v47, %v94_v45  ;;  %v101_v52 = vadd.f32 %v97_v48, %v95_v46 }
 0x15a   :  { %v102_v53 = vadd.f32 %v100_v51, %v98_v49  ;;  %v103_v54 = vadd.f32 %v101_v52, %v99_v50 }
 0x15c   :  { %108 = vst [vmem:[#allocation5] sm:$0xff] %v102_v53  ;;  %109 = vst [vmem:[#allocation5 + $0x8] sm:$0xff] %v103_v54 }
 0x15d   :  { %183 = shalt.err (!%p180_p12)
}
 0x15e   :  { %s184_s24 = scalar_lea.hbm %s237_s1, 256 }
 0x15f   :  { %p185_p13 = scmp.ne.s32.totalorder %s237_s1, %s184_s24  ;;  %p188_p0 = scmp.lt.u32.totalorder %s184_s24, %s237_s1 }
 0x161   :  { %p190_p1 = pnand %p188_p0, %p185_p13 }
 0x163   :  { %193 = shalt.err (!%p190_p1)
}
 0x164   :  { %119 = dma.vmem_to_hbm [thread:$0]  %s117_s20, 256, %s237_s1, [#allocation4]  }
 0x165   :  { %196 = dma.done.wait [#allocation4], 256  }
 0x166   :  { %197 = vsyncadd [#allocation4], 4294967040 }
 0x167   :  { %123 = vsyncpa [#allocation3], 1 }
 0x168   :  { %124 = vsyncpa [#allocation4], 1 }

</bundles_post_ra>
